<compile_context>
chip_gen: v7x
topology: tpu7x:2x2x1
jax: 0.10.0
libtpu: 0.0.40
codegen_flags: <defaults>
</compile_context>

<pallas_src>
import functools

import jax
import jax.numpy as jnp
from jax.experimental import pallas as pl
from jax.experimental.pallas import tpu as pltpu

_HIDDEN = 256


def _round_up(x, m):
    return ((x + m - 1) // m) * m


def classifier_kernel(x_ref, w1_ref, b1_ref, w2_ref, b2_ref, w3_ref, b3_ref,
                      o_ref):
    xv = x_ref[...]                              # (TB, Dp), f32 or bf16
    x_f32 = xv.astype(jnp.float32)

    # fc1: Linear(D, 256) + ReLU  (f32 accumulation on the MXU)
    h = jnp.dot(xv, w1_ref[...], preferred_element_type=jnp.float32)
    h = jnp.maximum(h + b1_ref[...], 0.0)

    # second Linear(256, D), then residual add with the original x
    y = jnp.dot(h.astype(w2_ref.dtype), w2_ref[...],
                preferred_element_type=jnp.float32)
    y = y + b2_ref[...] + x_f32

    # fc2: Linear(D, Cp)  (Cp = num_classes padded to 128 -> lane-dense store)
    out = jnp.dot(y.astype(w3_ref.dtype), w3_ref[...],
                  preferred_element_type=jnp.float32)
    out = out + b3_ref[...]

    o_ref[...] = out.astype(o_ref.dtype)


@functools.partial(jax.jit, static_argnames=("block_b", "compute_dtype"))
def classifier_forward(x, params, *, block_b=128, compute_dtype=jnp.float32):
    """x: (B, D) float32; params: dict (w*: (in,out), b*: (1,out)) in f32."""
    B, D = x.shape
    H = params["w1"].shape[1]
    C = params["w3"].shape[1]

    Dp = _round_up(D, 128)
    Cp = _round_up(C, 128)
    TB = block_b
    Bp = _round_up(B, TB)

    # Zero-pad everything to hardware-aligned shapes (zeros are exact no-ops
    # through matmul / bias / residual, so numerics are unchanged).
    xp = jnp.pad(x, ((0, Bp - B), (0, Dp - D))).astype(compute_dtype)
    w1 = jnp.pad(params["w1"], ((0, Dp - D), (0, 0))).astype(compute_dtype)
    b1 = params["b1"].astype(jnp.float32)
    w2 = jnp.pad(params["w2"], ((0, 0), (0, Dp - D))).astype(compute_dtype)
    b2 = jnp.pad(params["b2"], ((0, 0), (0, Dp - D))).astype(jnp.float32)
    w3 = jnp.pad(params["w3"], ((0, Dp - D), (0, Cp - C))).astype(compute_dtype)
    b3 = jnp.pad(params["b3"], ((0, 0), (0, Cp - C))).astype(jnp.float32)

    grid = (Bp // TB,)
    const = lambda i: (0, 0)          # weights / biases: VMEM-resident
    tiled = lambda i: (i, 0)          # activations: pipelined over batch

    itemsize = jnp.dtype(compute_dtype).itemsize
    cost = pl.CostEstimate(
        flops=2 * Bp * (Dp * H + H * Dp + Dp * Cp),
        transcendentals=0,
        bytes_accessed=(xp.size + w1.size + w2.size + w3.size) * itemsize
        + (b1.size + b2.size + b3.size) * 4 + Bp * Cp * 4,
    )

    out = pl.pallas_call(
        classifier_kernel,
        out_shape=jax.ShapeDtypeStruct((Bp, Cp), jnp.float32),
        grid_spec=pltpu.PrefetchScalarGridSpec(
            num_scalar_prefetch=0,
            grid=grid,
            in_specs=[
                pl.BlockSpec((TB, Dp), tiled),    # x
                pl.BlockSpec((Dp, H), const),     # w1
                pl.BlockSpec((1, H), const),      # b1
                pl.BlockSpec((H, Dp), const),     # w2
                pl.BlockSpec((1, Dp), const),     # b2
                pl.BlockSpec((Dp, Cp), const),    # w3
                pl.BlockSpec((1, Cp), const),     # b3
            ],
            out_specs=pl.BlockSpec((TB, Cp), tiled),
        ),
        compiler_params=pltpu.CompilerParams(
            dimension_semantics=("parallel",),
        ),
        cost_estimate=cost,
    )(xp, w1, b1, w2, b2, w3, b3)

    return out[:B, :C]


def init_params(key, input_dim, num_classes, hidden=_HIDDEN):
    """Deterministic synthetic init (PyTorch-Linear-style uniform bounds)."""
    ks = jax.random.split(key, 6)

    def lin(kw, kb, fan_in, fan_out):
        bound = 1.0 / jnp.sqrt(fan_in)
        w = jax.random.uniform(kw, (fan_in, fan_out), jnp.float32,
                               -bound, bound)
        b = jax.random.uniform(kb, (1, fan_out), jnp.float32, -bound, bound)
        return w, b

    w1, b1 = lin(ks[0], ks[1], input_dim, hidden)
    w2, b2 = lin(ks[2], ks[3], hidden, input_dim)
    w3, b3 = lin(ks[4], ks[5], input_dim, num_classes)
    return {"w1": w1, "b1": b1, "w2": w2, "b2": b2, "w3": w3, "b3": b3}


def reference_forward(x, p):
    """Pure-JAX reference matching the PyTorch forward."""
    h = jnp.maximum(x @ p["w1"] + p["b1"], 0.0)
    y = h @ p["w2"] + p["b2"] + x
    return y @ p["w3"] + p["b3"]


if __name__ == "__main__":
    key = jax.random.PRNGKey(0)
    k_x, k_p = jax.random.split(key)

    B, D, C = 8, 32, 10          # batch, input_dim, num_classes
    x = jax.random.normal(k_x, (B, D), jnp.float32)
    params = init_params(k_p, D, C)

    out = classifier_forward(x, params)     # f32 compute (exact vs reference)
    out = jax.block_until_ready(out)

    ref = reference_forward(x, params)
    assert out.shape == (B, C)
    assert jnp.allclose(out, ref, atol=1e-4, rtol=1e-4), "mismatch vs reference"

    # bf16 weight/activation path (v6e/v7x MXU-friendly), looser tolerance.
    out_bf16 = jax.block_until_ready(
        classifier_forward(x, params, compute_dtype=jnp.bfloat16))
    assert jnp.allclose(out_bf16, ref, atol=5e-2, rtol=5e-2), "bf16 mismatch"

    print("KERNEL_OK")
</pallas_src>

<mosaic_0001>
module attributes {stable_mosaic.version = 11 : i64} {
  func.func @classifier_kernel(%arg0: i32, %arg1: memref<128x128xf32, #tpu.memory_space<vmem>>, %arg2: memref<128x256xf32, #tpu.memory_space<vmem>>, %arg3: memref<1x256xf32, #tpu.memory_space<vmem>>, %arg4: memref<256x128xf32, #tpu.memory_space<vmem>>, %arg5: memref<1x128xf32, #tpu.memory_space<vmem>>, %arg6: memref<128x128xf32, #tpu.memory_space<vmem>>, %arg7: memref<1x128xf32, #tpu.memory_space<vmem>>, %arg8: memref<128x128xf32, #tpu.memory_space<vmem>>) attributes {dimension_semantics = [#tpu.dimension_semantics<parallel>], iteration_bounds = array<i64: 1>, scalar_prefetch = 0 : i64, scratch_operands = 0 : i64, tpu.core_type = #tpu.core_type<tc>, window_params = [{transform_indices = @transform_0, window_bounds = array<i64: 128, 128>}, {pipeline_mode = #tpu.pipeline_mode<synchronous>, transform_indices = @transform_1, window_bounds = array<i64: 128, 256>}, {pipeline_mode = #tpu.pipeline_mode<synchronous>, transform_indices = @transform_2, window_bounds = array<i64: 1, 256>}, {pipeline_mode = #tpu.pipeline_mode<synchronous>, transform_indices = @transform_3, window_bounds = array<i64: 256, 128>}, {pipeline_mode = #tpu.pipeline_mode<synchronous>, transform_indices = @transform_4, window_bounds = array<i64: 1, 128>}, {pipeline_mode = #tpu.pipeline_mode<synchronous>, transform_indices = @transform_5, window_bounds = array<i64: 128, 128>}, {pipeline_mode = #tpu.pipeline_mode<synchronous>, transform_indices = @transform_6, window_bounds = array<i64: 1, 128>}, {transform_indices = @transform_7, window_bounds = array<i64: 128, 128>}]} {
    %c0 = arith.constant 0 : index
    %c0_0 = arith.constant 0 : index
    %0 = vector.load %arg1[%c0, %c0_0] : memref<128x128xf32, #tpu.memory_space<vmem>>, vector<128x128xf32>
    %c0_1 = arith.constant 0 : index
    %c0_2 = arith.constant 0 : index
    %1 = vector.load %arg2[%c0_1, %c0_2] : memref<128x256xf32, #tpu.memory_space<vmem>>, vector<128x256xf32>
    %cst = arith.constant dense<0.000000e+00> : vector<128x256xf32>
    %2 = tpu.matmul %0, %1, %cst {dimension_numbers = #tpu.dot_dimension_numbers<[1], [0], [0], [1], [0, 0, 1, 1], [], []>} : vector<128x128xf32>, vector<128x256xf32>, vector<128x256xf32> -> vector<128x256xf32>
    %c0_3 = arith.constant 0 : index
    %c0_4 = arith.constant 0 : index
    %3 = vector.load %arg3[%c0_3, %c0_4] : memref<1x256xf32, #tpu.memory_space<vmem>>, vector<1x256xf32>
    %4 = vector.broadcast %3 : vector<1x256xf32> to vector<128x256xf32>
    %5 = arith.addf %2, %4 : vector<128x256xf32>
    %cst_5 = arith.constant 0.000000e+00 : f32
    %6 = vector.broadcast %cst_5 : f32 to vector<128x256xf32>
    %7 = arith.maximumf %5, %6 : vector<128x256xf32>
    %c0_6 = arith.constant 0 : index
    %c0_7 = arith.constant 0 : index
    %8 = vector.load %arg4[%c0_6, %c0_7] : memref<256x128xf32, #tpu.memory_space<vmem>>, vector<256x128xf32>
    %cst_8 = arith.constant dense<0.000000e+00> : vector<128x128xf32>
    %9 = tpu.matmul %7, %8, %cst_8 {dimension_numbers = #tpu.dot_dimension_numbers<[1], [0], [0], [1], [0, 0, 1, 1], [], []>} : vector<128x256xf32>, vector<256x128xf32>, vector<128x128xf32> -> vector<128x128xf32>
    %c0_9 = arith.constant 0 : index
    %c0_10 = arith.constant 0 : index
    %10 = vector.load %arg5[%c0_9, %c0_10] : memref<1x128xf32, #tpu.memory_space<vmem>>, vector<1x128xf32>
    %11 = vector.broadcast %10 : vector<1x128xf32> to vector<128x128xf32>
    %12 = arith.addf %9, %11 : vector<128x128xf32>
    %13 = arith.addf %12, %0 : vector<128x128xf32>
    %c0_11 = arith.constant 0 : index
    %c0_12 = arith.constant 0 : index
    %14 = vector.load %arg6[%c0_11, %c0_12] : memref<128x128xf32, #tpu.memory_space<vmem>>, vector<128x128xf32>
    %cst_13 = arith.constant dense<0.000000e+00> : vector<128x128xf32>
    %15 = tpu.matmul %13, %14, %cst_13 {dimension_numbers = #tpu.dot_dimension_numbers<[1], [0], [0], [1], [0, 0, 1, 1], [], []>} : vector<128x128xf32>, vector<128x128xf32>, vector<128x128xf32> -> vector<128x128xf32>
    %c0_14 = arith.constant 0 : index
    %c0_15 = arith.constant 0 : index
    %16 = vector.load %arg7[%c0_14, %c0_15] : memref<1x128xf32, #tpu.memory_space<vmem>>, vector<1x128xf32>
    %17 = vector.broadcast %16 : vector<1x128xf32> to vector<128x128xf32>
    %18 = arith.addf %15, %17 : vector<128x128xf32>
    %c0_16 = arith.constant 0 : index
    %c0_17 = arith.constant 0 : index
    %19 = vector.load %arg8[%c0_16, %c0_17] : memref<128x128xf32, #tpu.memory_space<vmem>>, vector<128x128xf32>
    tpu.vector_store %arg8[%c0_16, %c0_17], %18 {strides = array<i32>} : memref<128x128xf32, #tpu.memory_space<vmem>>, vector<128x128xf32>,
    return
  }
  func.func @transform_0(%arg0: i32) -> (i32, i32) {
    %c0_i32 = arith.constant 0 : i32
    %c0_i32_0 = arith.constant 0 : i32
    return %arg0, %c0_i32 : i32, i32
  }
  func.func @transform_1(%arg0: i32) -> (i32, i32) {
    %c0_i32 = arith.constant 0 : i32
    %c0_i32_0 = arith.constant 0 : i32
    %c0_i32_1 = arith.constant 0 : i32
    return %c0_i32, %c0_i32_0 : i32, i32
  }
  func.func @transform_2(%arg0: i32) -> (i32, i32) {
    %c0_i32 = arith.constant 0 : i32
    %c0_i32_0 = arith.constant 0 : i32
    %c0_i32_1 = arith.constant 0 : i32
    return %c0_i32, %c0_i32_0 : i32, i32
  }
  func.func @transform_3(%arg0: i32) -> (i32, i32) {
    %c0_i32 = arith.constant 0 : i32
    %c0_i32_0 = arith.constant 0 : i32
    %c0_i32_1 = arith.constant 0 : i32
    return %c0_i32, %c0_i32_0 : i32, i32
  }
  func.func @transform_4(%arg0: i32) -> (i32, i32) {
    %c0_i32 = arith.constant 0 : i32
    %c0_i32_0 = arith.constant 0 : i32
    %c0_i32_1 = arith.constant 0 : i32
    return %c0_i32, %c0_i32_0 : i32, i32
  }
  func.func @transform_5(%arg0: i32) -> (i32, i32) {
    %c0_i32 = arith.constant 0 : i32
    %c0_i32_0 = arith.constant 0 : i32
    %c0_i32_1 = arith.constant 0 : i32
    return %c0_i32, %c0_i32_0 : i32, i32
  }
  func.func @transform_6(%arg0: i32) -> (i32, i32) {
    %c0_i32 = arith.constant 0 : i32
    %c0_i32_0 = arith.constant 0 : i32
    %c0_i32_1 = arith.constant 0 : i32
    return %c0_i32, %c0_i32_0 : i32, i32
  }
  func.func @transform_7(%arg0: i32) -> (i32, i32) {
    %c0_i32 = arith.constant 0 : i32
    %c0_i32_0 = arith.constant 0 : i32
    return %arg0, %c0_i32 : i32, i32
  }
}

</mosaic_0001>

<bundles_post_ra>
// kernel: classifier_forward.1
= control target key start
LH: loop header
LB: loop body
LE: loop exit
PB: predicated region body
PF: predicated region fallthrough
CT: control target
= control target key end

     0   :  { %v950_v3 = vmov 0.0   ;;  %s1476_s1 = inlined_call_operand.vmem [shape: f32[128,256], index: 1, kind: input, shape index: {}]   ;;  %s1477_s3 = inlined_call_operand.vmem [shape: f32[256,128], index: 3, kind: input, shape index: {}]   ;;  %s1478_s0 = inlined_call_operand.vmem [shape: f32[128,128], index: 0, kind: input, shape index: {}]   ;;  %s1479_s5 = inlined_call_operand.vmem [shape: f32[128,128], index: 5, kind: input, shape index: {}]   ;;  %s1480_s2 = inlined_call_operand.vmem [shape: f32[1,256], index: 2, kind: input, shape index: {}]   ;;  %s1481_s4 = inlined_call_operand.vmem [shape: f32[1,128], index: 4, kind: input, shape index: {}]   ;;  %s1482_s6 = inlined_call_operand.vmem [shape: f32[1,128], index: 6, kind: input, shape index: {}]   ;;  %s1483_s7 = inlined_call_operand.vmem [shape: f32[128,128], index: 7, kind: output, shape index: {}]  }
   0x1   :  { %v43_v0 = vld [vmem:[%s1476_s1 + $0x8] sm:$0xff]  ;;  %v45_v1 = vld [vmem:[%s1476_s1 + $0x18] sm:$0xff]  ;;  %v42_v2 = vld [vmem:[%s1476_s1] sm:$0xff]  ;;  %150 = vmatprep.mubr.f32.mxu0 %v950_v3 }
   0x2   :  { %v837_v4 = vpack.c.bf16 %v45_v1, %v43_v0  ;;  %v44_v5 = vld [vmem:[%s1476_s1 + $0x10] sm:$0xff]  ;;  %v47_v6 = vld [vmem:[%s1476_s1 + $0x28] sm:$0xff]  ;;  %v49_v7 = vld [vmem:[%s1476_s1 + $0x38] sm:$0xff] }
   0x3   :  { %v839_v8 = vpack.c.bf16 %v44_v5, %v42_v2  ;;  %v841_v9 = vpack.c.bf16 %v49_v7, %v47_v6  ;;  %v46_v10 = vld [vmem:[%s1476_s1 + $0x20] sm:$0xff]  ;;  %v48_v11 = vld [vmem:[%s1476_s1 + $0x30] sm:$0xff]  ;;  %v51_v12 = vld [vmem:[%s1476_s1 + $0x48] sm:$0xff] }
   0x4   :  { %838 = vmatprep.subr.bf16.mxu0 %v837_v4  ;;  %v53_v13 = vld [vmem:[%s1476_s1 + $0x58] sm:$0xff]  ;;  %v843_v14 = vpack.c.bf16 %v48_v11, %v46_v10  ;;  %v50_v16 = vld [vmem:[%s1476_s1 + $0x40] sm:$0xff]  ;;  %v52_v17 = vld [vmem:[%s1476_s1 + $0x50] sm:$0xff] }
   0x5   :  { %840 = vmatpush1.bf16.msra.mxu0 %v839_v8  ;;  %v845_v15 = vpack.c.bf16 %v53_v13, %v51_v12  ;;  %v55_v18 = vld [vmem:[%s1476_s1 + $0x68] sm:$0xff]  ;;  %v57_v19 = vld [vmem:[%s1476_s1 + $0x78] sm:$0xff]  ;;  %v847_v20 = vpack.c.bf16 %v52_v17, %v50_v16  ;;  %v54_v22 = vld [vmem:[%s1476_s1 + $0x60] sm:$0xff] }
   0x6   :  { %842 = vmatprep.subr.bf16.mxu0 %v841_v9  ;;  %v849_v21 = vpack.c.bf16 %v57_v19, %v55_v18  ;;  %v56_v23 = vld [vmem:[%s1476_s1 + $0x70] sm:$0xff]  ;;  %v59_v24 = vld [vmem:[%s1476_s1 + $0x88] sm:$0xff]  ;;  %v61_v25 = vld [vmem:[%s1476_s1 + $0x98] sm:$0xff] }
   0x7   :  { %v851_v26 = vpack.c.bf16 %v56_v23, %v54_v22  ;;  %v853_v27 = vpack.c.bf16 %v61_v25, %v59_v24  ;;  %v58_v28 = vld [vmem:[%s1476_s1 + $0x80] sm:$0xff]  ;;  %v60_v29 = vld [vmem:[%s1476_s1 + $0x90] sm:$0xff]  ;;  %v63_v30 = vld [vmem:[%s1476_s1 + $0xa8] sm:$0xff] }
   0x8   :  { %v65_v31 = vld [vmem:[%s1476_s1 + $0xb8] sm:$0xff]  ;;  %v62_v32 = vld [vmem:[%s1476_s1 + $0xa0] sm:$0xff]  ;;  %v64_v33 = vld [vmem:[%s1476_s1 + $0xb0] sm:$0xff]  ;;  %v855_v34 = vpack.c.bf16 %v60_v29, %v58_v28 }
   0x9   :  { %844 = vmatpush1.bf16.msra.mxu0 %v843_v14  ;;  %v67_v35 = vld [vmem:[%s1476_s1 + $0xc8] sm:$0xff]  ;;  %v69_v36 = vld [vmem:[%s1476_s1 + $0xd8] sm:$0xff]  ;;  %v295_v37 = vld [vmem:[%s1477_s3 + $0x80] sm:$0xff]  ;;  %v857_v40 = vpack.c.bf16 %v65_v31, %v63_v30  ;;  %v859_v51 = vpack.c.bf16 %v64_v33, %v62_v32 }
   0xa   :  { %846 = vmatprep.subr.bf16.mxu0 %v845_v15  ;;  %v296_v38 = vld [vmem:[%s1477_s3 + $0x88] sm:$0xff]  ;;  %v279_v39 = vld [vmem:[%s1477_s3] sm:$0xff]  ;;  %v297_v43 = vld [vmem:[%s1477_s3 + $0x90] sm:$0xff]  ;;  %v861_v55 = vpack.c.bf16 %v69_v36, %v67_v35 }
   0xb   :  { %v869_v41 = vpack.c.bf16 %v296_v38, %v295_v37  ;;  %v280_v42 = vld [vmem:[%s1477_s3 + $0x8] sm:$0xff]  ;;  %v298_v44 = vld [vmem:[%s1477_s3 + $0x98] sm:$0xff]  ;;  %v281_v47 = vld [vmem:[%s1477_s3 + $0x10] sm:$0xff] }
   0xc   :  { %v871_v45 = vpack.c.bf16 %v280_v42, %v279_v39  ;;  %v873_v46 = vpack.c.bf16 %v298_v44, %v297_v43  ;;  %v282_v48 = vld [vmem:[%s1477_s3 + $0x18] sm:$0xff]  ;;  %v299_v49 = vld [vmem:[%s1477_s3 + $0xa0] sm:$0xff]  ;;  %v300_v50 = vld [vmem:[%s1477_s3 + $0xa8] sm:$0xff] }
   0xd   :  { %848 = vmatpush1.bf16.msra.mxu0 %v847_v20  ;;  %870 = vmatprep.subr.bf16.mxu1 %v869_v41  ;;  %v66_v52 = vld [vmem:[%s1476_s1 + $0xc0] sm:$0xff]  ;;  %v68_v53 = vld [vmem:[%s1476_s1 + $0xd0] sm:$0xff]  ;;  %v875_v54 = vpack.c.bf16 %v282_v48, %v281_v47  ;;  %v71_v56 = vld [vmem:[%s1476_s1 + $0xe8] sm:$0xff]  ;;  %v877_v57 = vpack.c.bf16 %v300_v50, %v299_v49 }
   0xe   :  { %850 = vmatprep.subr.bf16.mxu0 %v849_v21  ;;  %872 = vmatpush3.bf16.msra.mxu1 %v871_v45  ;;  %v283_v58 = vld [vmem:[%s1477_s3 + $0x20] sm:$0xff]  ;;  %v284_v59 = vld [vmem:[%s1477_s3 + $0x28] sm:$0xff]  ;;  %v73_v60 = vld [vmem:[%s1476_s1 + $0xf8] sm:$0xff]  ;;  %v863_v63 = vpack.c.bf16 %v68_v53, %v66_v52 }
   0xf   :  { %874 = vmatprep.subr.bf16.mxu1 %v873_v46  ;;  %v301_v61 = vld [vmem:[%s1477_s3 + $0xb0] sm:$0xff]  ;;  %v302_v62 = vld [vmem:[%s1477_s3 + $0xb8] sm:$0xff]  ;;  %v70_v0 = vld [vmem:[%s1476_s1 + $0xe0] sm:$0xff]  ;;  %v879_v1 = vpack.c.bf16 %v284_v59, %v283_v58  ;;  %v865_v2 = vpack.c.bf16 %v73_v60, %v71_v56 }
  0x10   :  { %v72_v4 = vld [vmem:[%s1476_s1 + $0xf0] sm:$0xff]  ;;  %v881_v5 = vpack.c.bf16 %v302_v62, %v301_v61  ;;  %v286_v7 = vld [vmem:[%s1477_s3 + $0x38] sm:$0xff]  ;;  %v303_v8 = vld [vmem:[%s1477_s3 + $0xc0] sm:$0xff] }
  0x11   :  { %852 = vmatpush1.bf16.msra.mxu0 %v851_v26  ;;  %v285_v6 = vld [vmem:[%s1477_s3 + $0x30] sm:$0xff]  ;;  %v304_v9 = vld [vmem:[%s1477_s3 + $0xc8] sm:$0xff]  ;;  %v867_v10 = vpack.c.bf16 %v72_v4, %v70_v0  ;;  %v287_v13 = vld [vmem:[%s1477_s3 + $0x40] sm:$0xff]  ;;  %v76_v0 = vlaneseq }
  0x12   :  { %854 = vmatprep.subr.bf16.mxu0 %v853_v27  ;;  %876 = vmatpush3.bf16.msra.mxu1 %v875_v54  ;;  %v883_v11 = vpack.c.bf16 %v286_v7, %v285_v6  ;;  %v885_v12 = vpack.c.bf16 %v304_v9, %v303_v8  ;;  %v288_v14 = vld [vmem:[%s1477_s3 + $0x48] sm:$0xff]  ;;  %v305_v15 = vld [vmem:[%s1477_s3 + $0xd0] sm:$0xff]  ;;  %v306_v16 = vld [vmem:[%s1477_s3 + $0xd8] sm:$0xff] }
  0x13   :  { %878 = vmatprep.subr.bf16.mxu1 %v877_v57  ;;  %v1157_v17 = vld [vmem:[%s1478_s0] sm:$0xff]  ;;  %v887_v18 = vpack.c.bf16 %v288_v14, %v287_v13  ;;  %v889_v19 = vpack.c.bf16 %v306_v16, %v305_v15  ;;  %v289_v20 = vld [vmem:[%s1477_s3 + $0x50] sm:$0xff]  ;;  %v290_v21 = vld [vmem:[%s1477_s3 + $0x58] sm:$0xff] }
  0x14   :  { %v307_v22 = vld [vmem:[%s1477_s3 + $0xe0] sm:$0xff]  ;;  %v308_v23 = vld [vmem:[%s1477_s3 + $0xe8] sm:$0xff]  ;;  %v891_v25 = vpack.c.bf16 %v290_v21, %v289_v20  ;;  %v1183_v27 = vld [vmem:[%s1478_s0 + $0x10] sm:$0xff] }
  0x15   :  { %856 = vmatpush1.bf16.msra.mxu0 %v855_v34  ;;  %v1176_v24 = vld [vmem:[%s1478_s0 + $0x8] sm:$0xff]  ;;  %v893_v26 = vpack.c.bf16 %v308_v23, %v307_v22  ;;  %v1190_v28 = vld [vmem:[%s1478_s0 + $0x18] sm:$0xff]  ;;  %v1197_v29 = vld [vmem:[%s1478_s0 + $0x20] sm:$0xff] }
  0x16   :  { %858 = vmatprep.subr.bf16.mxu0 %v857_v40  ;;  %880 = vmatpush3.bf16.msra.mxu1 %v879_v1  ;;  %v1204_v30 = vld [vmem:[%s1478_s0 + $0x28] sm:$0xff]  ;;  %v1211_v31 = vld [vmem:[%s1478_s0 + $0x30] sm:$0xff]  ;;  %v1218_v32 = vld [vmem:[%s1478_s0 + $0x38] sm:$0xff]  ;;  %v77_v1 = vshrl.u32 %v76_v0, 7 }
  0x17   :  { %882 = vmatprep.subr.bf16.mxu1 %v881_v5  ;;  %v1225_v33 = vld [vmem:[%s1478_s0 + $0x40] sm:$0xff]  ;;  %v1232_v34 = vld [vmem:[%s1478_s0 + $0x48] sm:$0xff]  ;;  %v1239_v35 = vld [vmem:[%s1478_s0 + $0x50] sm:$0xff] }
  0x18   :  { %v1246_v36 = vld [vmem:[%s1478_s0 + $0x58] sm:$0xff]  ;;  %v1253_v37 = vld [vmem:[%s1478_s0 + $0x60] sm:$0xff]  ;;  %v1260_v38 = vld [vmem:[%s1478_s0 + $0x68] sm:$0xff]  ;;  %v82_v5 = vsub.s32 1, %v77_v1 }
  0x19   :  { %860 = vmatpush1.bf16.msra.mxu0 %v859_v51  ;;  %v1267_v39 = vld [vmem:[%s1478_s0 + $0x70] sm:$0xff]  ;;  %v1274_v40 = vld [vmem:[%s1478_s0 + $0x78] sm:$0xff]  ;;  %v291_v41 = vld [vmem:[%s1477_s3 + $0x60] sm:$0xff] }
  0x1a   :  { %862 = vmatprep.subr.bf16.mxu0 %v861_v55  ;;  %884 = vmatpush3.bf16.msra.mxu1 %v883_v11  ;;  %v292_v42 = vld [vmem:[%s1477_s3 + $0x68] sm:$0xff]  ;;  %v310_v44 = vld [vmem:[%s1477_s3 + $0xf8] sm:$0xff]  ;;  %v293_v46 = vld [vmem:[%s1477_s3 + $0x70] sm:$0xff] }
  0x1b   :  { %886 = vmatprep.subr.bf16.mxu1 %v885_v12  ;;  %v895_v43 = vpack.c.bf16 %v292_v42, %v291_v41  ;;  %v294_v47 = vld [vmem:[%s1477_s3 + $0x78] sm:$0xff]  ;;  %v479_v49 = vld [vmem:[%s1479_s5] sm:$0xff]  ;;  %v480_v50 = vld [vmem:[%s1479_s5 + $0x8] sm:$0xff] }
  0x1c   :  { %v899_v48 = vpack.c.bf16 %v294_v47, %v293_v46  ;;  %v481_v51 = vld [vmem:[%s1479_s5 + $0x10] sm:$0xff]  ;;  %v901_v52 = vpack.c.bf16 %v480_v50, %v479_v49  ;;  %v482_v53 = vld [vmem:[%s1479_s5 + $0x18] sm:$0xff]  ;;  %v483_v55 = vld [vmem:[%s1479_s5 + $0x20] sm:$0xff] }
  0x1d   :  { %864 = vmatpush1.bf16.msra.mxu0 %v863_v63  ;;  %v905_v54 = vpack.c.bf16 %v482_v53, %v481_v51  ;;  %v484_v56 = vld [vmem:[%s1479_s5 + $0x28] sm:$0xff]  ;;  %v485_v58 = vld [vmem:[%s1479_s5 + $0x30] sm:$0xff]  ;;  %v486_v59 = vld [vmem:[%s1479_s5 + $0x38] sm:$0xff] }
  0x1e   :  { %866 = vmatprep.subr.bf16.mxu0 %v865_v2  ;;  %888 = vmatpush3.bf16.msra.mxu1 %v887_v18  ;;  %v909_v57 = vpack.c.bf16 %v484_v56, %v483_v55  ;;  %v913_v60 = vpack.c.bf16 %v486_v59, %v485_v58  ;;  %v487_v61 = vld [vmem:[%s1479_s5 + $0x40] sm:$0xff]  ;;  %v488_v62 = vld [vmem:[%s1479_s5 + $0x48] sm:$0xff]  ;;  %v78_v2 = vsub.s32 0, %v77_v1 }
  0x1f   :  { %890 = vmatprep.subr.bf16.mxu1 %v889_v19  ;;  %v1325_v63 = vpack.c.bf16 %v488_v62, %v487_v61  ;;  %v74_v4 = vld [vmem:[%s1480_s2] sm:$0x3] }
  0x20   :  { %v1332_v6 = vrot.slane %v74_v4, %v78_v2  ;;  %v1334_v7 = vrot.slane %v74_v4, %v82_v5 }
  0x21   :  { %868 = vmatpush1.bf16.msra.mxu0 %v867_v10 }
  0x22   :  { %892 = vmatpush3.bf16.msra.mxu1 %v891_v25  ;;  %902 = vmatprep.subr.bf16.mxu0 %v901_v52 }
  0x23   :  { %894 = vmatprep.subr.bf16.mxu1 %v893_v26 }
  0x24   :  { %151 = vmatmul.mubr.f32.vlgmr.msra.gmra.mrb[0].mxu0 %v1157_v17 }
  0x25   :  { %156 = vmatprep.mubr.f32.mxu0 %v950_v3  ;;  %904 = vmatpush3.bf16.msra.mxu0 %v901_v52 }
  0x26   :  { %896 = vmatpush3.bf16.msra.mxu1 %v895_v43  ;;  %906 = vmatprep.subr.bf16.mxu0 %v905_v54 }
  0x28   :  { %157 = vmatmul.mubr.f32.gmra.mrb[2].mxu0 %v1176_v24 }
  0x29   :  { %162 = vmatprep.mubr.f32.mxu0 %v950_v3  ;;  %908 = vmatpush3.bf16.msra.mxu0 %v905_v54 }
  0x2a   :  { %910 = vmatprep.subr.bf16.mxu0 %v909_v57 }
  0x2c   :  { %163 = vmatmul.mubr.f32.gmra.mrb[4].mxu0 %v1183_v27 }
  0x2d   :  { %168 = vmatprep.mubr.f32.mxu0 %v950_v3  ;;  %912 = vmatpush3.bf16.msra.mxu0 %v909_v57 }
  0x2e   :  { %914 = vmatprep.subr.bf16.mxu0 %v913_v60 }
  0x30   :  { %169 = vmatmul.mubr.f32.gmra.mrb[6].mxu0 %v1190_v28 }
  0x31   :  { %174 = vmatprep.mubr.f32.mxu0 %v950_v3  ;;  %916 = vmatpush3.bf16.msra.mxu0 %v913_v60 }
  0x32   :  { %918 = vmatprep.subr.bf16.mxu0 %v1325_v63 }
  0x34   :  { %175 = vmatmul.mubr.f32.gmra.mrb[8].mxu0 %v1197_v29 }
  0x35   :  { %180 = vmatprep.mubr.f32.mxu0 %v950_v3  ;;  %920 = vmatpush3.bf16.msra.mxu0 %v1325_v63 }
  0x38   :  { %181 = vmatmul.mubr.f32.gmra.mrb[10].mxu0 %v1204_v30 }
  0x39   :  { %186 = vmatprep.mubr.f32.mxu0 %v950_v3 }
  0x3c   :  { %187 = vmatmul.mubr.f32.gmra.mrb[12].mxu0 %v1211_v31 }
  0x3d   :  { %192 = vmatprep.mubr.f32.mxu0 %v950_v3 }
  0x40   :  { %193 = vmatmul.mubr.f32.gmra.mrb[14].mxu0 %v1218_v32 }
  0x41   :  { %198 = vmatprep.mubr.f32.mxu0 %v950_v3 }
  0x44   :  { %199 = vmatmul.mubr.f32.gmra.mrb[16].mxu0 %v1225_v33 }
  0x45   :  { %204 = vmatprep.mubr.f32.mxu0 %v950_v3 }
  0x48   :  { %205 = vmatmul.mubr.f32.gmra.mrb[18].mxu0 %v1232_v34 }
  0x49   :  { %210 = vmatprep.mubr.f32.mxu0 %v950_v3 }
  0x4c   :  { %211 = vmatmul.mubr.f32.gmra.mrb[20].mxu0 %v1239_v35 }
  0x4d   :  { %216 = vmatprep.mubr.f32.mxu0 %v950_v3 }
  0x50   :  { %217 = vmatmul.mubr.f32.gmra.mrb[22].mxu0 %v1246_v36 }
  0x51   :  { %222 = vmatprep.mubr.f32.mxu0 %v950_v3 }
  0x54   :  { %223 = vmatmul.mubr.f32.gmra.mrb[24].mxu0 %v1253_v37 }
  0x55   :  { %228 = vmatprep.mubr.f32.mxu0 %v950_v3 }
  0x58   :  { %229 = vmatmul.mubr.f32.gmra.mrb[26].mxu0 %v1260_v38 }
  0x59   :  { %234 = vmatprep.mubr.f32.mxu0 %v950_v3 }
  0x5c   :  { %235 = vmatmul.mubr.f32.gmra.mrb[28].mxu0 %v1267_v39 }
  0x5d   :  { %240 = vmatprep.mubr.f32.mxu0 %v950_v3  ;;  %v309_v3 = vld [vmem:[%s1477_s3 + $0xf0] sm:$0xff] }
  0x5e   :  { %v897_v45 = vpack.c.bf16 %v310_v44, %v309_v3 }
  0x60   :  { %241 = vmatmul.mubr.f32.gmra.mrb[30].mxu0 %v1274_v40  ;;  %898 = vmatprep.subr.bf16.mxu1 %v897_v45 }
  0x61   :  { %900 = vmatpush3.bf16.msra.mxu1 %v899_v48 }
  0x62   :  { %933 = vmatprep.subr.bf16.mxu1 %v901_v52 }
  0xf7   :  { %v152_v8 = vpop.f32.mrb[0].mxu0 }
  0xf8   :  { %v153_v9 = vadd.f32 %v152_v8, %v1332_v6  ;;  %v154_v10 = vpop.f32.mrb[1].mxu0 }
  0xf9   :  { %v155_v11 = vadd.f32 %v154_v10, %v1334_v7 }
  0xfa   :  { %v247_v14 = vmax.f32 %v153_v9, 0.0 }
  0xfb   :  { %v158_v12 = vpop.f32.mrb[2].mxu0  ;;  %v248_v13 = vmax.f32 %v155_v11, 0.0 }
  0xfc   :  { %v159_v15 = vadd.f32 %v158_v12, %v1332_v6  ;;  %v160_v16 = vpop.f32.mrb[3].mxu0 }
  0xfd   :  { %v161_v18 = vadd.f32 %v160_v16, %v1334_v7  ;;  %382 = vmatprep.mubr.f32.mxu1 %v248_v13 }
  0xfe   :  { %383 = vmatmul.mubr.f32.vlgmr.msra.gmra.mrb[0].mxu1 %v247_v14  ;;  %v249_v21 = vmax.f32 %v159_v15, 0.0 }
  0xff   :  { %v250_v19 = vmax.f32 %v161_v18, 0.0  ;;  %v164_v20 = vpop.f32.mrb[4].mxu0  ;;  %941 = vmatpush3.bf16.msra.mxu1 %v901_v52 }
 0x100   :  { %v165_v22 = vadd.f32 %v164_v20, %v1332_v6  ;;  %v166_v23 = vpop.f32.mrb[5].mxu0  ;;  %934 = vmatprep.subr.bf16.mxu1 %v905_v54 }
 0x101   :  { %v167_v25 = vadd.f32 %v166_v23, %v1334_v7  ;;  %387 = vmatprep.mubr.f32.mxu1 %v250_v19 }
 0x102   :  { %388 = vmatmul.mubr.f32.gmra.mrb[2].mxu1 %v249_v21  ;;  %v251_v42 = vmax.f32 %v165_v22, 0.0 }
 0x103   :  { %v252_v26 = vmax.f32 %v167_v25, 0.0  ;;  %v170_v41 = vpop.f32.mrb[6].mxu0  ;;  %942 = vmatpush3.bf16.msra.mxu1 %v905_v54 }
 0x104   :  { %v171_v43 = vadd.f32 %v170_v41, %v1332_v6  ;;  %v172_v3 = vpop.f32.mrb[7].mxu0  ;;  %935 = vmatprep.subr.bf16.mxu1 %v909_v57 }
 0x105   :  { %v173_v44 = vadd.f32 %v172_v3, %v1334_v7  ;;  %392 = vmatprep.mubr.f32.mxu1 %v252_v26 }
 0x106   :  { %393 = vmatmul.mubr.f32.gmra.mrb[4].mxu1 %v251_v42  ;;  %v253_v47 = vmax.f32 %v171_v43, 0.0 }
 0x107   :  { %v254_v45 = vmax.f32 %v173_v44, 0.0  ;;  %v176_v46 = vpop.f32.mrb[8].mxu0  ;;  %943 = vmatpush3.bf16.msra.mxu1 %v909_v57 }
 0x108   :  { %v177_v48 = vadd.f32 %v176_v46, %v1332_v6  ;;  %v178_v49 = vpop.f32.mrb[9].mxu0  ;;  %936 = vmatprep.subr.bf16.mxu1 %v913_v60 }
 0x109   :  { %v179_v50 = vadd.f32 %v178_v49, %v1334_v7  ;;  %397 = vmatprep.mubr.f32.mxu1 %v254_v45 }
 0x10a   :  { %398 = vmatmul.mubr.f32.gmra.mrb[6].mxu1 %v253_v47  ;;  %v255_v53 = vmax.f32 %v177_v48, 0.0 }
 0x10b   :  { %v256_v51 = vmax.f32 %v179_v50, 0.0  ;;  %v182_v52 = vpop.f32.mrb[10].mxu0  ;;  %944 = vmatpush3.bf16.msra.mxu1 %v913_v60 }
 0x10c   :  { %v183_v54 = vadd.f32 %v182_v52, %v1332_v6  ;;  %v184_v55 = vpop.f32.mrb[11].mxu0  ;;  %937 = vmatprep.subr.bf16.mxu1 %v1325_v63 }
 0x10d   :  { %v185_v56 = vadd.f32 %v184_v55, %v1334_v7  ;;  %402 = vmatprep.mubr.f32.mxu1 %v256_v51 }
 0x10e   :  { %403 = vmatmul.mubr.f32.gmra.mrb[8].mxu1 %v255_v53  ;;  %v257_v59 = vmax.f32 %v183_v54, 0.0 }
 0x10f   :  { %v258_v57 = vmax.f32 %v185_v56, 0.0  ;;  %v188_v58 = vpop.f32.mrb[12].mxu0  ;;  %945 = vmatpush3.bf16.msra.mxu1 %v1325_v63 }
 0x110   :  { %v189_v61 = vadd.f32 %v188_v58, %v1332_v6  ;;  %v190_v62 = vpop.f32.mrb[13].mxu0 }
 0x111   :  { %v191_v60 = vadd.f32 %v190_v62, %v1334_v7  ;;  %407 = vmatprep.mubr.f32.mxu1 %v258_v57 }
 0x112   :  { %408 = vmatmul.mubr.f32.gmra.mrb[10].mxu1 %v257_v59  ;;  %v259_v2 = vmax.f32 %v189_v61, 0.0 }
 0x113   :  { %v260_v0 = vmax.f32 %v191_v60, 0.0  ;;  %v194_v1 = vpop.f32.mrb[14].mxu0 }
 0x114   :  { %v195_v4 = vadd.f32 %v194_v1, %v1332_v6  ;;  %v196_v5 = vpop.f32.mrb[15].mxu0 }
 0x115   :  { %v197_v8 = vadd.f32 %v196_v5, %v1334_v7  ;;  %412 = vmatprep.mubr.f32.mxu1 %v260_v0 }
 0x116   :  { %413 = vmatmul.mubr.f32.gmra.mrb[12].mxu1 %v259_v2  ;;  %v261_v10 = vmax.f32 %v195_v4, 0.0 }
 0x117   :  { %v262_v9 = vmax.f32 %v197_v8, 0.0  ;;  %v200_v63 = vpop.f32.mrb[16].mxu0 }
 0x118   :  { %v201_v11 = vadd.f32 %v200_v63, %v1332_v6  ;;  %v202_v12 = vpop.f32.mrb[17].mxu0 }
 0x119   :  { %v203_v13 = vadd.f32 %v202_v12, %v1334_v7  ;;  %417 = vmatprep.mubr.f32.mxu1 %v262_v9  ;;  %v489_v12 = vld [vmem:[%s1479_s5 + $0x50] sm:$0xff] }
 0x11a   :  { %418 = vmatmul.mubr.f32.gmra.mrb[14].mxu1 %v261_v10  ;;  %v263_v16 = vmax.f32 %v201_v11, 0.0 }
 0x11b   :  { %v264_v14 = vmax.f32 %v203_v13, 0.0  ;;  %v206_v15 = vpop.f32.mrb[18].mxu0  ;;  %v490_v13 = vld [vmem:[%s1479_s5 + $0x58] sm:$0xff] }
 0x11c   :  { %v207_v18 = vadd.f32 %v206_v15, %v1332_v6  ;;  %v208_v19 = vpop.f32.mrb[19].mxu0 }
 0x11d   :  { %v209_v20 = vadd.f32 %v208_v19, %v1334_v7  ;;  %422 = vmatprep.mubr.f32.mxu1 %v264_v14  ;;  %v921_v14 = vpack.c.bf16 %v490_v13, %v489_v12 }
 0x11e   :  { %423 = vmatmul.mubr.f32.gmra.mrb[16].mxu1 %v263_v16  ;;  %v265_v23 = vmax.f32 %v207_v18, 0.0  ;;  %v493_v16 = vld [vmem:[%s1479_s5 + $0x70] sm:$0xff]  ;;  %v494_v18 = vld [vmem:[%s1479_s5 + $0x78] sm:$0xff] }
 0x11f   :  { %v266_v21 = vmax.f32 %v209_v20, 0.0  ;;  %v212_v22 = vpop.f32.mrb[20].mxu0  ;;  %922 = vmatprep.subr.bf16.mxu0 %v921_v14  ;;  %938 = vmatprep.subr.bf16.mxu1 %v921_v14  ;;  %v929_v19 = vpack.c.bf16 %v494_v18, %v493_v16 }
 0x120   :  { %v213_v25 = vadd.f32 %v212_v22, %v1332_v6  ;;  %v214_v26 = vpop.f32.mrb[21].mxu0  ;;  %924 = vmatpush3.bf16.msra.mxu0 %v921_v14  ;;  %946 = vmatpush3.bf16.msra.mxu1 %v921_v14 }
 0x121   :  { %v215_v41 = vadd.f32 %v214_v26, %v1334_v7  ;;  %427 = vmatprep.mubr.f32.mxu1 %v266_v21  ;;  %v1391_v21 = vld [vmem:[%s1481_s4] ss:$0 sm:$0xff] }
 0x122   :  { %428 = vmatmul.mubr.f32.gmra.mrb[18].mxu1 %v265_v23  ;;  %v267_v3 = vmax.f32 %v213_v25, 0.0 }
 0x123   :  { %v268_v42 = vmax.f32 %v215_v41, 0.0  ;;  %v218_v43 = vpop.f32.mrb[22].mxu0 }
 0x124   :  { %v219_v44 = vadd.f32 %v218_v43, %v1332_v6  ;;  %v220_v45 = vpop.f32.mrb[23].mxu0 }
 0x125   :  { %v221_v46 = vadd.f32 %v220_v45, %v1334_v7  ;;  %432 = vmatprep.mubr.f32.mxu1 %v268_v42 }
 0x126   :  { %433 = vmatmul.mubr.f32.gmra.mrb[20].mxu1 %v267_v3  ;;  %v269_v49 = vmax.f32 %v219_v44, 0.0 }
 0x127   :  { %v270_v47 = vmax.f32 %v221_v46, 0.0  ;;  %v224_v48 = vpop.f32.mrb[24].mxu0 }
 0x128   :  { %v225_v50 = vadd.f32 %v224_v48, %v1332_v6  ;;  %v226_v51 = vpop.f32.mrb[25].mxu0 }
 0x129   :  { %v227_v52 = vadd.f32 %v226_v51, %v1334_v7  ;;  %437 = vmatprep.mubr.f32.mxu1 %v270_v47 }
 0x12a   :  { %438 = vmatmul.mubr.f32.gmra.mrb[22].mxu1 %v269_v49  ;;  %v271_v55 = vmax.f32 %v225_v50, 0.0 }
 0x12b   :  { %v272_v53 = vmax.f32 %v227_v52, 0.0  ;;  %v230_v54 = vpop.f32.mrb[26].mxu0 }
 0x12c   :  { %v231_v56 = vadd.f32 %v230_v54, %v1332_v6  ;;  %v232_v57 = vpop.f32.mrb[27].mxu0 }
 0x12d   :  { %v233_v58 = vadd.f32 %v232_v57, %v1334_v7  ;;  %442 = vmatprep.mubr.f32.mxu1 %v272_v53 }
 0x12e   :  { %443 = vmatmul.mubr.f32.gmra.mrb[24].mxu1 %v271_v55  ;;  %v273_v62 = vmax.f32 %v231_v56, 0.0 }
 0x12f   :  { %v274_v59 = vmax.f32 %v233_v58, 0.0  ;;  %v236_v61 = vpop.f32.mrb[28].mxu0 }
 0x130   :  { %v237_v60 = vadd.f32 %v236_v61, %v1332_v6  ;;  %v238_v0 = vpop.f32.mrb[29].mxu0 }
 0x131   :  { %v239_v1 = vadd.f32 %v238_v0, %v1334_v7  ;;  %447 = vmatprep.mubr.f32.mxu1 %v274_v59 }
 0x132   :  { %448 = vmatmul.mubr.f32.gmra.mrb[26].mxu1 %v273_v62  ;;  %v275_v5 = vmax.f32 %v237_v60, 0.0 }
 0x133   :  { %v276_v2 = vmax.f32 %v239_v1, 0.0  ;;  %v242_v4 = vpop.f32.mrb[30].mxu0 }
 0x134   :  { %v243_v8 = vadd.f32 %v242_v4, %v1332_v6  ;;  %v244_v9 = vpop.f32.mrb[31].mxu0  ;;  %v491_v6 = vld [vmem:[%s1479_s5 + $0x60] sm:$0xff] }
 0x135   :  { %v245_v63 = vadd.f32 %v244_v9, %v1334_v7  ;;  %452 = vmatprep.mubr.f32.mxu1 %v276_v2  ;;  %v492_v7 = vld [vmem:[%s1479_s5 + $0x68] sm:$0xff] }
 0x136   :  { %453 = vmatmul.mubr.f32.gmra.mrb[28].mxu1 %v275_v5  ;;  %v277_v11 = vmax.f32 %v243_v8, 0.0  ;;  %v925_v15 = vpack.c.bf16 %v492_v7, %v491_v6 }
 0x137   :  { %v278_v10 = vmax.f32 %v245_v63, 0.0 }
 0x138   :  { %926 = vmatprep.subr.bf16.mxu0 %v925_v15  ;;  %939 = vmatprep.subr.bf16.mxu1 %v925_v15 }
 0x139   :  { %457 = vmatprep.mubr.f32.mxu1 %v278_v10  ;;  %928 = vmatpush3.bf16.msra.mxu0 %v925_v15 }
 0x13a   :  { %458 = vmatmul.mubr.f32.gmra.mrb[30].mxu1 %v277_v11  ;;  %930 = vmatprep.subr.bf16.mxu0 %v929_v19 }
 0x13b   :  { %947 = vmatpush3.bf16.msra.mxu1 %v925_v15 }
 0x13c   :  { %940 = vmatprep.subr.bf16.mxu1 %v929_v19 }
 0x13d   :  { %932 = vmatpush3.bf16.msra.mxu0 %v929_v19 }
 0x13f   :  { %948 = vmatpush3.bf16.msra.mxu1 %v929_v19 }
 0x1d1   :  { %v701_v20 = vpop.f32.mrb[0].mxu1 }
 0x1d2   :  { %v702_v22 = vpop.f32.mrb[1].mxu1 }
 0x1d3   :  { %v703_v23 = vadd.f32 %v702_v22, %v701_v20 }
 0x1d5   :  { %v385_v25 = vadd.f32 %v703_v23, %v1391_v21  ;;  %v704_v26 = vpop.f32.mrb[2].mxu1 }
 0x1d6   :  { %v705_v41 = vpop.f32.mrb[3].mxu1 }
 0x1d7   :  { %v706_v42 = vadd.f32 %v705_v41, %v704_v26  ;;  %v463_v43 = vadd.f32 %v385_v25, %v1157_v17 }
 0x1d9   :  { %v390_v3 = vadd.f32 %v706_v42, %v1391_v21  ;;  %v707_v44 = vpop.f32.mrb[4].mxu1  ;;  %813 = vmatprep.mubr.f32.mxu0 %v463_v43 }
 0x1da   :  { %v708_v45 = vpop.f32.mrb[5].mxu1 }
 0x1db   :  { %v464_v46 = vadd.f32 %v390_v3, %v1176_v24  ;;  %v709_v47 = vadd.f32 %v708_v45, %v707_v44 }
 0x1dd   :  { %v395_v48 = vadd.f32 %v709_v47, %v1391_v21  ;;  %v710_v49 = vpop.f32.mrb[6].mxu1  ;;  %814 = vmatmul.mubr.f32.vlgmr.msra.gmra.mrb[32].mxu0 %v464_v46 }
 0x1de   :  { %v711_v50 = vpop.f32.mrb[7].mxu1 }
 0x1df   :  { %v712_v51 = vadd.f32 %v711_v50, %v710_v49  ;;  %v465_v52 = vadd.f32 %v395_v48, %v1183_v27 }
 0x1e1   :  { %v400_v53 = vadd.f32 %v712_v51, %v1391_v21  ;;  %v713_v54 = vpop.f32.mrb[8].mxu1  ;;  %816 = vmatprep.mubr.f32.mxu0 %v465_v52 }
 0x1e2   :  { %v714_v17 = vpop.f32.mrb[9].mxu1 }
 0x1e3   :  { %v715_v55 = vadd.f32 %v714_v17, %v713_v54  ;;  %v466_v56 = vadd.f32 %v400_v53, %v1190_v28  ;;  %v668_v17 = vld [vmem:[%s1482_s6] ss:$0 sm:$0xff] }
 0x1e5   :  { %v405_v57 = vadd.f32 %v715_v55, %v1391_v21  ;;  %v716_v24 = vpop.f32.mrb[10].mxu1  ;;  %817 = vmatmul.mubr.f32.gmra.mrb[34].mxu0 %v466_v56 }
 0x1e6   :  { %v717_v58 = vpop.f32.mrb[11].mxu1 }
 0x1e7   :  { %v718_v59 = vadd.f32 %v717_v58, %v716_v24  ;;  %v467_v61 = vadd.f32 %v405_v57, %v1197_v29 }
 0x1e9   :  { %v410_v62 = vadd.f32 %v718_v59, %v1391_v21  ;;  %v719_v60 = vpop.f32.mrb[12].mxu1  ;;  %819 = vmatprep.mubr.f32.mxu0 %v467_v61 }
 0x1ea   :  { %v720_v27 = vpop.f32.mrb[13].mxu1 }
 0x1eb   :  { %v721_v0 = vadd.f32 %v720_v27, %v719_v60  ;;  %v468_v1 = vadd.f32 %v410_v62, %v1204_v30 }
 0x1ed   :  { %v415_v2 = vadd.f32 %v721_v0, %v1391_v21  ;;  %v722_v4 = vpop.f32.mrb[14].mxu1  ;;  %820 = vmatmul.mubr.f32.gmra.mrb[36].mxu0 %v468_v1 }
 0x1ee   :  { %v723_v28 = vpop.f32.mrb[15].mxu1 }
 0x1ef   :  { %v724_v5 = vadd.f32 %v723_v28, %v722_v4  ;;  %v469_v8 = vadd.f32 %v415_v2, %v1211_v31 }
 0x1f1   :  { %v420_v9 = vadd.f32 %v724_v5, %v1391_v21  ;;  %v725_v63 = vpop.f32.mrb[16].mxu1  ;;  %822 = vmatprep.mubr.f32.mxu0 %v469_v8 }
 0x1f2   :  { %v726_v29 = vpop.f32.mrb[17].mxu1 }
 0x1f3   :  { %v727_v10 = vadd.f32 %v726_v29, %v725_v63  ;;  %v470_v11 = vadd.f32 %v420_v9, %v1218_v32 }
 0x1f5   :  { %v425_v12 = vadd.f32 %v727_v10, %v1391_v21  ;;  %v728_v13 = vpop.f32.mrb[18].mxu1  ;;  %823 = vmatmul.mubr.f32.gmra.mrb[38].mxu0 %v470_v11 }
 0x1f6   :  { %v729_v30 = vpop.f32.mrb[19].mxu1 }
 0x1f7   :  { %v730_v14 = vadd.f32 %v729_v30, %v728_v13  ;;  %v471_v6 = vadd.f32 %v425_v12, %v1225_v33 }
 0x1f9   :  { %v430_v7 = vadd.f32 %v730_v14, %v1391_v21  ;;  %v731_v15 = vpop.f32.mrb[20].mxu1  ;;  %825 = vmatprep.mubr.f32.mxu1 %v471_v6 }
 0x1fa   :  { %v732_v31 = vpop.f32.mrb[21].mxu1 }
 0x1fb   :  { %v472_v16 = vadd.f32 %v430_v7, %v1232_v34  ;;  %v733_v18 = vadd.f32 %v732_v31, %v731_v15 }
 0x1fd   :  { %v435_v19 = vadd.f32 %v733_v18, %v1391_v21  ;;  %v734_v20 = vpop.f32.mrb[22].mxu1  ;;  %826 = vmatmul.mubr.f32.vlgmr.msra.gmra.mrb[32].mxu1 %v472_v16 }
 0x1fe   :  { %v735_v32 = vpop.f32.mrb[23].mxu1 }
 0x1ff   :  { %v736_v22 = vadd.f32 %v735_v32, %v734_v20  ;;  %v473_v23 = vadd.f32 %v435_v19, %v1239_v35 }
 0x201   :  { %v440_v25 = vadd.f32 %v736_v22, %v1391_v21  ;;  %v737_v26 = vpop.f32.mrb[24].mxu1  ;;  %828 = vmatprep.mubr.f32.mxu1 %v473_v23 }
 0x202   :  { %v738_v33 = vpop.f32.mrb[25].mxu1 }
 0x203   :  { %v739_v41 = vadd.f32 %v738_v33, %v737_v26  ;;  %v474_v42 = vadd.f32 %v440_v25, %v1246_v36 }
 0x205   :  { %v445_v43 = vadd.f32 %v739_v41, %v1391_v21  ;;  %v740_v34 = vpop.f32.mrb[26].mxu1  ;;  %829 = vmatmul.mubr.f32.gmra.mrb[34].mxu1 %v474_v42 }
 0x206   :  { %v741_v3 = vpop.f32.mrb[27].mxu1 }
 0x207   :  { %v742_v44 = vadd.f32 %v741_v3, %v740_v34  ;;  %v475_v45 = vadd.f32 %v445_v43, %v1253_v37 }
 0x209   :  { %v450_v46 = vadd.f32 %v742_v44, %v1391_v21  ;;  %v743_v47 = vpop.f32.mrb[28].mxu1  ;;  %831 = vmatprep.mubr.f32.mxu1 %v475_v45 }
 0x20a   :  { %v744_v35 = vpop.f32.mrb[29].mxu1 }
 0x20b   :  { %v745_v48 = vadd.f32 %v744_v35, %v743_v47  ;;  %v476_v49 = vadd.f32 %v450_v46, %v1260_v38 }
 0x20d   :  { %v455_v50 = vadd.f32 %v745_v48, %v1391_v21  ;;  %v746_v51 = vpop.f32.mrb[30].mxu1  ;;  %832 = vmatmul.mubr.f32.gmra.mrb[36].mxu1 %v476_v49 }
 0x20e   :  { %v747_v36 = vpop.f32.mrb[31].mxu1 }
 0x20f   :  { %v748_v52 = vadd.f32 %v747_v36, %v746_v51  ;;  %v477_v53 = vadd.f32 %v455_v50, %v1267_v39 }
 0x211   :  { %v460_v54 = vadd.f32 %v748_v52, %v1391_v21  ;;  %834 = vmatprep.mubr.f32.mxu1 %v477_v53 }
 0x213   :  { %v478_v37 = vadd.f32 %v460_v54, %v1274_v40 }
 0x215   :  { %835 = vmatmul.mubr.f32.gmra.mrb[38].mxu1 %v478_v37 }
 0x2b0   :  { %v815_v55 = vpop.f32.mrb[32].mxu0 }
 0x2b1   :  { %v574_v38 = vadd.f32 %v815_v55, %v668_v17  ;;  %v568_v56 = vpop.f32.mrb[33].mxu0 }
 0x2b2   :  { %v569_v57 = vadd.f32 %v668_v17, %v568_v56 }
 0x2b3   :  { %648 = vst [vmem:[%s1483_s7 + $0x8] sm:$0xff] %v574_v38 }
 0x2b4   :  { %647 = vst [vmem:[%s1483_s7] sm:$0xff] %v569_v57 }
 0x2b8   :  { %v818_v39 = vpop.f32.mrb[34].mxu0 }
 0x2b9   :  { %v584_v21 = vadd.f32 %v818_v39, %v668_v17  ;;  %v578_v40 = vpop.f32.mrb[35].mxu0 }
 0x2ba   :  { %v579_v24 = vadd.f32 %v668_v17, %v578_v40 }
 0x2bb   :  { %650 = vst [vmem:[%s1483_s7 + $0x18] sm:$0xff] %v584_v21 }
 0x2bc   :  { %649 = vst [vmem:[%s1483_s7 + $0x10] sm:$0xff] %v579_v24 }
 0x2c0   :  { %v821_v58 = vpop.f32.mrb[36].mxu0 }
 0x2c1   :  { %v594_v59 = vadd.f32 %v821_v58, %v668_v17  ;;  %v588_v61 = vpop.f32.mrb[37].mxu0 }
 0x2c2   :  { %v589_v62 = vadd.f32 %v668_v17, %v588_v61 }
 0x2c3   :  { %652 = vst [vmem:[%s1483_s7 + $0x28] sm:$0xff] %v594_v59 }
 0x2c4   :  { %651 = vst [vmem:[%s1483_s7 + $0x20] sm:$0xff] %v589_v62 }
 0x2c8   :  { %v824_v60 = vpop.f32.mrb[38].mxu0 }
 0x2c9   :  { %v604_v27 = vadd.f32 %v824_v60, %v668_v17  ;;  %v598_v0 = vpop.f32.mrb[39].mxu0 }
 0x2ca   :  { %v599_v1 = vadd.f32 %v668_v17, %v598_v0 }
 0x2cb   :  { %654 = vst [vmem:[%s1483_s7 + $0x38] sm:$0xff] %v604_v27 }
 0x2cc   :  { %653 = vst [vmem:[%s1483_s7 + $0x30] sm:$0xff] %v599_v1 }
 0x2d0   :  { %v827_v2 = vpop.f32.mrb[32].mxu1 }
 0x2d1   :  { %v614_v4 = vadd.f32 %v827_v2, %v668_v17  ;;  %v608_v28 = vpop.f32.mrb[33].mxu1 }
 0x2d2   :  { %v609_v5 = vadd.f32 %v668_v17, %v608_v28 }
 0x2d3   :  { %656 = vst [vmem:[%s1483_s7 + $0x48] sm:$0xff] %v614_v4 }
 0x2d4   :  { %655 = vst [vmem:[%s1483_s7 + $0x40] sm:$0xff] %v609_v5 }
 0x2d8   :  { %v830_v8 = vpop.f32.mrb[34].mxu1 }
 0x2d9   :  { %v624_v9 = vadd.f32 %v830_v8, %v668_v17  ;;  %v618_v63 = vpop.f32.mrb[35].mxu1 }
 0x2da   :  { %v619_v29 = vadd.f32 %v668_v17, %v618_v63 }
 0x2db   :  { %658 = vst [vmem:[%s1483_s7 + $0x58] sm:$0xff] %v624_v9 }
 0x2dc   :  { %657 = vst [vmem:[%s1483_s7 + $0x50] sm:$0xff] %v619_v29 }
 0x2e0   :  { %v833_v10 = vpop.f32.mrb[36].mxu1 }
 0x2e1   :  { %v634_v11 = vadd.f32 %v833_v10, %v668_v17  ;;  %v628_v12 = vpop.f32.mrb[37].mxu1 }
 0x2e2   :  { %v629_v13 = vadd.f32 %v668_v17, %v628_v12 }
 0x2e3   :  { %660 = vst [vmem:[%s1483_s7 + $0x68] sm:$0xff] %v634_v11 }
 0x2e4   :  { %659 = vst [vmem:[%s1483_s7 + $0x60] sm:$0xff] %v629_v13 }
 0x2e8   :  { %v836_v30 = vpop.f32.mrb[38].mxu1 }
 0x2e9   :  { %v644_v14 = vadd.f32 %v836_v30, %v668_v17  ;;  %v638_v6 = vpop.f32.mrb[39].mxu1 }
 0x2ea   :  { %v639_v7 = vadd.f32 %v668_v17, %v638_v6 }
 0x2eb   :  { %662 = vst [vmem:[%s1483_s7 + $0x78] sm:$0xff] %v644_v14 }
 0x2ec   :  { %661 = vst [vmem:[%s1483_s7 + $0x70] sm:$0xff] %v639_v7 }

</bundles_post_ra>
